<compile_context>
chip_gen: v7x
topology: tpu7x:2x2x1
jax: 0.10.0
libtpu: 0.0.40
codegen_flags: <defaults>
</compile_context>

<pallas_src>
import functools

import jax
import jax.numpy as jnp
from jax.experimental import pallas as pl
from jax.experimental.pallas import tpu as pltpu


def _identity_kernel(x_ref, o_ref):
    # Pure pass-through on the VMEM tile (lane-dense, unmasked stores).
    o_ref[...] = x_ref[...]


def _chip_profile():
    """(target_block_bytes, num_tensorcores) for the attached TPU generation."""
    try:
        kind = jax.devices()[0].device_kind.lower()
    except Exception:  # defensive: fall back to conservative settings
        kind = ""
    if "v5" in kind:            # v5e/v5p: ~0.8 TB/s HBM, 16 MiB scoped default
        return 2 * 1024 * 1024, 1
    if "v6" in kind:            # v6e: ~1.4 TB/s HBM, plenty of VMEM headroom
        return 4 * 1024 * 1024, 1
    if "7" in kind:             # v7x: ~3.2 TB/s HBM, 64 MiB VMEM, 2 TCs/chip
        return 8 * 1024 * 1024, 2
    return 2 * 1024 * 1024, 1   # conservative default (fits every generation)


def _tile_plan(total, itemsize, target_bytes, num_cores):
    """Pick (rows, cols, row_tile) for a lane-dense identity copy."""
    # Minimum sublane granule for this dtype (8 for 32-bit, 16 for 16-bit, ...).
    sub = 8 * max(1, 4 // itemsize)

    # Column tile: the largest multiple-of-128 divisor of `total` whose
    # minimum-height (sub rows) block still fits the per-block budget.  This
    # bounds per-block bytes for arbitrarily wide inputs.
    max_cols = max(128, (target_bytes // (sub * itemsize)) // 128 * 128)
    cols = 128
    c = min(max_cols, total) // 128 * 128
    while c >= 128:
        if total % c == 0:
            cols = c
            break
        c -= 128
    rows = total // cols

    if rows <= sub:
        # Single full-dim block (tiny inputs); valid via the full-array-dim
        # exception of the (8, 128) rule.
        return rows, cols, rows

    # Row tile: fill the per-block budget, multiple of `sub`.
    tr = max(sub, (target_bytes // (cols * itemsize)) // sub * sub)
    # On multi-TensorCore chips make sure the "parallel" grid axis has work for
    # every core (aim for >= 2 grid steps per core when rows allow it).
    if num_cores > 1 and rows >= 2 * num_cores * sub:
        tr = min(tr, max(sub, (rows // (2 * num_cores)) // sub * sub))
    tr = min(tr, rows // sub * sub)
    return rows, cols, tr


@functools.partial(jax.jit, donate_argnums=0)
def horcnn_forward(x: jax.Array) -> jax.Array:
    """Pallas equivalent of HORCNN.forward (stub => identity on the input)."""
    # TODO(synk): reference HORCNN.forward is an empty stub (`pass`); no
    #             conv/fc layers are defined in __init__, so only an identity
    #             data path is implementable without inventing semantics.
    total = x.size
    itemsize = jnp.dtype(x.dtype).itemsize

    if total == 0 or total % 128 != 0:
        # Non-lane-alignable totals: the stub's semantics is identity, so skip
        # the copy kernel entirely (0 bytes of traffic beats any tiling).
        return x

    target_bytes, num_cores = _chip_profile()
    rows, cols, tr = _tile_plan(total, itemsize, target_bytes, num_cores)

    x2d = x.reshape(rows, cols)
    block_bytes = tr * cols * itemsize
    grid = (pl.cdiv(rows, tr),)

    out2d = pl.pallas_call(
        _identity_kernel,
        out_shape=jax.ShapeDtypeStruct((rows, cols), x2d.dtype),
        grid=grid,
        in_specs=[pl.BlockSpec((tr, cols), lambda i: (i, 0))],
        out_specs=pl.BlockSpec((tr, cols), lambda i: (i, 0)),
        # Output aliases the (donated) input: no fresh HBM output allocation.
        input_output_aliases={0: 0},
        cost_estimate=pl.CostEstimate(
            flops=0,
            transcendentals=0,
            bytes_accessed=2 * total * itemsize,
        ),
        compiler_params=pltpu.CompilerParams(
            dimension_semantics=("parallel",),
            # 2x double-buffered (in + out) blocks + slack, floored at 16 MiB.
            vmem_limit_bytes=max(16 * 1024 * 1024,
                                 4 * block_bytes + 4 * 1024 * 1024),
        ),
    )(x2d)

    return out2d.reshape(x.shape)


if __name__ == "__main__":
    key = jax.random.PRNGKey(0)
    shape = (2, 4, 16, 16)  # small NCHW input consistent with a CNN-style module
    x = jax.random.normal(key, shape, dtype=jnp.float32)
    # `x` is donated to the kernel, so regenerate the same deterministic values
    # for the correctness check instead of reading the donated buffer.
    x_expected = jax.random.normal(key, shape, dtype=jnp.float32)

    y = horcnn_forward(x)
    jax.block_until_ready(y)

    # Sanity: identity semantics (the stub forward performs no computation).
    assert y.shape == shape
    assert bool(jnp.allclose(y, x_expected))

    print("KERNEL_OK")
</pallas_src>

<mosaic_0001>
module attributes {stable_mosaic.version = 11 : i64} {
  func.func @_identity_kernel(%arg0: i32, %arg1: memref<1x2048xf32, #tpu.memory_space<vmem>>, %arg2: memref<1x2048xf32, #tpu.memory_space<vmem>>) attributes {dimension_semantics = [#tpu.dimension_semantics<parallel>], iteration_bounds = array<i64: 1>, scalar_prefetch = 0 : i64, scratch_operands = 0 : i64, tpu.core_type = #tpu.core_type<tc>, window_params = [{transform_indices = @transform_0, window_bounds = array<i64: 1, 2048>}, {transform_indices = @transform_1, window_bounds = array<i64: 1, 2048>}]} {
    %c0 = arith.constant 0 : index
    %c0_0 = arith.constant 0 : index
    %0 = vector.load %arg1[%c0, %c0_0] : memref<1x2048xf32, #tpu.memory_space<vmem>>, vector<1x2048xf32>
    %c0_1 = arith.constant 0 : index
    %c0_2 = arith.constant 0 : index
    %1 = vector.load %arg2[%c0_1, %c0_2] : memref<1x2048xf32, #tpu.memory_space<vmem>>, vector<1x2048xf32>
    tpu.vector_store %arg2[%c0_1, %c0_2], %0 {strides = array<i32>} : memref<1x2048xf32, #tpu.memory_space<vmem>>, vector<1x2048xf32>,
    return
  }
  func.func @transform_0(%arg0: i32) -> (i32, i32) {
    %c0_i32 = arith.constant 0 : i32
    %c0_i32_0 = arith.constant 0 : i32
    return %arg0, %c0_i32 : i32, i32
  }
  func.func @transform_1(%arg0: i32) -> (i32, i32) {
    %c0_i32 = arith.constant 0 : i32
    %c0_i32_0 = arith.constant 0 : i32
    return %arg0, %c0_i32 : i32, i32
  }
}

</mosaic_0001>

<bundles_post_ra>
// kernel: horcnn_forward.1
= control target key start
LH: loop header
LB: loop body
LE: loop exit
PB: predicated region body
PF: predicated region fallthrough
CT: control target
= control target key end

     0   :  { %s38_s0 = inlined_call_operand.vmem [shape: f32[1,2048], index: 0, kind: input, shape index: {}, may-alias: {0,1}]   ;;  %s39_s1 = inlined_call_operand.vmem [shape: f32[1,2048], index: 1, kind: output, shape index: {}, may-alias: {0,1}]  }
   0x1   :  { %v8_v0 = vld [vmem:[%s38_s0] sm:$0xff]  ;;  %v9_v1 = vld [vmem:[%s38_s0 + $0x8] sm:$0xff] }
   0x2   :  { %10 = vst [vmem:[%s39_s1] sm:$0xff] %v8_v0  ;;  %11 = vst [vmem:[%s39_s1 + $0x8] sm:$0xff] %v9_v1 }

</bundles_post_ra>
